<compile_context>
chip_gen: v7x
topology: tpu7x:2x2x1
jax: 0.10.0
libtpu: 0.0.40
codegen_flags: <defaults>
</compile_context>

<pallas_src>
import functools

import jax
import jax.numpy as jnp
from jax import lax
from jax.experimental import pallas as pl
from jax.experimental.pallas import tpu as pltpu


def _round_up(x, m):
    return ((x + m - 1) // m) * m


# ---------------------------------------------------------------------------
# Kernel 1: row-tiled linear projection  dep = x @ W^T   (+ row squared norms)
# ---------------------------------------------------------------------------
def _project_kernel(x_ref, w_ref, dep_ref, sq_ref):
    # x_ref: (1, tR, E), w_ref: (E, Dp), dep_ref: (1, tR, Dp), sq_ref: (1, tR, 1)
    acc = jnp.dot(x_ref[0], w_ref[...], preferred_element_type=jnp.float32)
    dep = acc.astype(dep_ref.dtype)
    dep_ref[0] = dep
    d32 = dep.astype(jnp.float32)          # norms consistent with what the Gram sees
    sq_ref[0] = jnp.sum(d32 * d32, axis=-1, keepdims=True)


# ---------------------------------------------------------------------------
# Kernel 2: pairwise squared distances, Gram form on the MXU
# ---------------------------------------------------------------------------
def _pdist_kernel(dep_i_ref, dep_t_ref, sq_i_ref, sq_j_ref, dist_ref, *,
                  j_resident):
    # dep_i_ref: (1, tL, Dp)            native dtype
    # dep_t_ref: (1, nT, Dp, tL) if j_resident (per-batch resident slab)
    #            (1, 1,  Dp, tL) otherwise
    # sq_i_ref:  (1, tL, 1) f32 ; sq_j_ref: (1, 1, tL) f32 ; dist_ref: (1, tL, tL)
    di = dep_i_ref[0]
    if j_resident:
        djt = dep_t_ref[0, pl.program_id(2)]         # (Dp, tL), no DMA refetch
    else:
        djt = dep_t_ref[0, 0]                        # (Dp, tL)
    # Gram on the MXU in the operands' native dtype, f32 accumulation.
    g = lax.dot_general(di, djt, (((1,), (0,)), ((), ())),
                        preferred_element_type=jnp.float32)      # (tL, tL) f32
    dist = sq_i_ref[0] + sq_j_ref[0] - 2.0 * g
    # Clamp tiny negatives from floating-point cancellation (diag ~0, not 0).
    dist_ref[0] = jnp.maximum(dist, 0.0).astype(dist_ref.dtype)


# ---------------------------------------------------------------------------
# Wrapper
# ---------------------------------------------------------------------------
def rooted_graph_predictor(emb_sentences, weight, *, l_tile=512,
                           vmem_budget_bytes=10 * 1024 * 1024):
    """Forward pass of RootedGraphPredictor.

    emb_sentences: [B, L, E] activations.
    weight:        [D, E]    nn.Linear weight (no bias, PyTorch layout).
    Returns (dep_embeddings [B, L, D], distances [B, L, L]).
    """
    B, L, E = emb_sentences.shape
    D = weight.shape[0]
    x_dtype = emb_sentences.dtype
    itx = jnp.dtype(x_dtype).itemsize
    itw = jnp.dtype(weight.dtype).itemsize

    # ---- tiling / minimal padding --------------------------------------
    Dp = _round_up(D, 128)                       # lane-dense dep / Gram K-dim
    if L <= l_tile:
        Lp, tL = L, L                            # no L padding, one tile per batch
    else:
        Lp = _round_up(L, 128)                   # minimal halo (< 128 rows)
        tL = 128
        for cand in (512, 256):
            if cand <= l_tile and Lp % cand == 0:
                tL = cand
                break
    nT = Lp // tL

    # Projection row tile: divides Lp, double-buffered blocks under budget
    # (keeps v5e 16 MiB / v7x 32 MiB scoped-VMEM defaults happy).
    def _proj_bytes(tr):
        return (2 * tr * E * itx            # x block (double buffered)
                + 2 * tr * Dp * itx         # dep out block
                + 2 * tr * 4                # norm out block (f32)
                + 2 * E * Dp * itw)         # weight (assume double buffered)

    if Lp % 128 != 0:
        tR = Lp                              # small un-padded L: block == full dims
    else:
        tR = 128
        for cand in (512, 256):
            if Lp % cand == 0 and _proj_bytes(cand) <= vmem_budget_bytes:
                tR = cand
                break
        # TODO(synk): for very large E*Dp (several MiB), add a K-axis over E
        # with an f32 VMEM accumulator instead of shrinking tR further.
    nR = Lp // tR

    # ---- pad inputs (zero padding is mathematically inert; sliced off) --
    x_p = emb_sentences
    if Lp != L:
        x_p = jnp.pad(x_p, ((0, 0), (0, Lp - L), (0, 0)))
    w_t = weight.T                               # keep the weight in its OWN dtype
    if Dp != D:
        w_t = jnp.pad(w_t, ((0, 0), (0, Dp - D)))

    # ---- 1) projection over (B, Lp) rows + per-row squared norms --------
    def _proj_call(single_buffer_w):
        if single_buffer_w:
            # Grid-invariant weight: single-buffered halves its VMEM footprint.
            w_spec = pl.BlockSpec((E, Dp), lambda b, r: (0, 0),
                                  pipeline_mode=pl.Buffered(1))
        else:
            w_spec = pl.BlockSpec((E, Dp), lambda b, r: (0, 0))
        return pl.pallas_call(
            _project_kernel,
            out_shape=(jax.ShapeDtypeStruct((B, Lp, Dp), x_dtype),
                       jax.ShapeDtypeStruct((B, Lp, 1), jnp.float32)),
            grid_spec=pltpu.PrefetchScalarGridSpec(
                num_scalar_prefetch=0,
                grid=(B, nR),
                in_specs=[
                    pl.BlockSpec((1, tR, E), lambda b, r: (b, r, 0)),
                    w_spec,
                ],
                out_specs=[
                    pl.BlockSpec((1, tR, Dp), lambda b, r: (b, r, 0)),
                    pl.BlockSpec((1, tR, 1), lambda b, r: (b, r, 0)),
                ]),
            compiler_params=pltpu.CompilerParams(
                dimension_semantics=("parallel", "parallel")),
        )

    try:
        dep_p, sq_p = _proj_call(True)(x_p, w_t)
    except Exception:
        # pipeline_mode=pl.Buffered(1) unsupported on this jax/libtpu combo:
        # fall back to the (correct, slightly more VMEM-hungry) default.
        dep_p, sq_p = _proj_call(False)(x_p, w_t)

    # Cheap layout plumbing for the distance kernel (dep is only ~Dp/Lp of the
    # dist traffic, so one extra pass over it is negligible):
    #   dep_t4[b, t, :, :] = dep_p[b, t*tL:(t+1)*tL, :].T   -> (B, nT, Dp, tL)
    dep_t4 = jnp.transpose(dep_p.reshape(B, nT, tL, Dp), (0, 1, 3, 2))
    sq_t = sq_p.reshape(B, 1, Lp)                              # row norms as a row

    # ---- 2) tiled pairwise squared distances ----------------------------
    pdist_bytes = (2 * tL * Dp * itx            # dep_i (double buffered)
                   + 2 * Lp * Dp * itx          # resident dep^T slab
                   + 2 * tL * tL * itx          # dist out
                   + 4 * tL * 4)                # sq_i + sq_j (f32)
    j_resident = (nT > 1) and (pdist_bytes <= vmem_budget_bytes)

    if j_resident:
        # Whole per-batch dep^T resident: DMA'd once per b, not once per (b, i).
        dep_t_spec = pl.BlockSpec((1, nT, Dp, tL), lambda b, i, j: (b, 0, 0, 0))
    else:
        dep_t_spec = pl.BlockSpec((1, 1, Dp, tL), lambda b, i, j: (b, j, 0, 0))

    dist_p = pl.pallas_call(
        functools.partial(_pdist_kernel, j_resident=j_resident),
        out_shape=jax.ShapeDtypeStruct((B, Lp, Lp), x_dtype),
        grid_spec=pltpu.PrefetchScalarGridSpec(
            num_scalar_prefetch=0,
            grid=(B, nT, nT),
            in_specs=[
                pl.BlockSpec((1, tL, Dp), lambda b, i, j: (b, i, 0)),
                dep_t_spec,
                pl.BlockSpec((1, tL, 1), lambda b, i, j: (b, i, 0)),
                pl.BlockSpec((1, 1, tL), lambda b, i, j: (b, 0, j)),
            ],
            out_specs=pl.BlockSpec((1, tL, tL), lambda b, i, j: (b, i, j)),
        ),
        compiler_params=pltpu.CompilerParams(
            dimension_semantics=("parallel", "parallel", "parallel")),
    )(dep_p, dep_t4, sq_p, sq_t)

    # Slice the padding halo off only when padding actually happened.
    dep = dep_p if (Lp == L and Dp == D) else dep_p[:, :L, :D]
    dist = dist_p if Lp == L else dist_p[:, :L, :L]
    return dep, dist


def reference(emb_sentences, weight):
    dep = jnp.einsum("ble,de->bld", emb_sentences, weight)
    diff = dep[:, :, None, :] - dep[:, None, :, :]
    dist = jnp.sum(diff * diff, axis=-1)
    return dep, dist


if __name__ == "__main__":
    # Small shapes consistent with the module's forward:
    B, L, E, D = 2, 8, 32, 32

    key = jax.random.PRNGKey(0)
    k_x, k_w = jax.random.split(key)
    emb_sentences = jax.random.normal(k_x, (B, L, E), dtype=jnp.float32)
    # Deterministic in-script init of the Linear weight (no bias), [D, E].
    bound = 1.0 / (E ** 0.5)
    weight = jax.random.uniform(k_w, (D, E), dtype=jnp.float32,
                                minval=-bound, maxval=bound)

    dep, dist = rooted_graph_predictor(emb_sentences, weight)
    dep = jax.block_until_ready(dep)
    dist = jax.block_until_ready(dist)

    dep_ref, dist_ref = reference(emb_sentences, weight)
    assert dep.shape == (B, L, D) and dist.shape == (B, L, L)
    assert jnp.allclose(dep, dep_ref, atol=1e-5, rtol=1e-5)
    assert jnp.allclose(dist, dist_ref, atol=1e-4, rtol=1e-4)

    # Also exercise the padded / multi-tile / resident-j path
    # (L not a multiple of 128, D < 128, nT > 1).
    B2, L2, E2, D2 = 2, 160, 32, 32
    k_x2, k_w2 = jax.random.split(jax.random.PRNGKey(1))
    x2 = jax.random.normal(k_x2, (B2, L2, E2), dtype=jnp.float32)
    w2 = jax.random.uniform(k_w2, (D2, E2), dtype=jnp.float32,
                            minval=-bound, maxval=bound)
    dep2, dist2 = rooted_graph_predictor(x2, w2, l_tile=128)
    dep2 = jax.block_until_ready(dep2)
    dist2 = jax.block_until_ready(dist2)
    dep2_ref, dist2_ref = reference(x2, w2)
    assert dep2.shape == (B2, L2, D2) and dist2.shape == (B2, L2, L2)
    assert jnp.allclose(dep2, dep2_ref, atol=1e-5, rtol=1e-5)
    assert jnp.allclose(dist2, dist2_ref, atol=1e-4, rtol=1e-4)

    print("KERNEL_OK")
</pallas_src>

<mosaic_0001>
module attributes {stable_mosaic.version = 11 : i64} {
  func.func @_project_kernel(%arg0: i32, %arg1: i32, %arg2: memref<1x8x32xf32, #tpu.memory_space<vmem>>, %arg3: memref<32x128xf32, #tpu.memory_space<vmem>>, %arg4: memref<1x8x128xf32, #tpu.memory_space<vmem>>, %arg5: memref<1x8x1xf32, #tpu.memory_space<vmem>>) attributes {dimension_semantics = [#tpu.dimension_semantics<parallel>, #tpu.dimension_semantics<parallel>], iteration_bounds = array<i64: 2, 1>, scalar_prefetch = 0 : i64, scratch_operands = 0 : i64, tpu.core_type = #tpu.core_type<tc>, window_params = [{transform_indices = @transform_0, window_bounds = array<i64: 1, 8, 32>}, {pipeline_mode = #tpu.pipeline_mode<synchronous>, transform_indices = @transform_1, window_bounds = array<i64: 32, 128>}, {transform_indices = @transform_2, window_bounds = array<i64: 1, 8, 128>}, {transform_indices = @transform_3, window_bounds = array<i64: 1, 8, 1>}]} {
    %c0 = arith.constant 0 : index
    %c0_0 = arith.constant 0 : index
    %c0_1 = arith.constant 0 : index
    %0 = vector.load %arg2[%c0, %c0_0, %c0_1] : memref<1x8x32xf32, #tpu.memory_space<vmem>>, vector<1x8x32xf32>
    %1 = vector.shape_cast %0 : vector<1x8x32xf32> to vector<8x32xf32>
    %c0_2 = arith.constant 0 : index
    %c0_3 = arith.constant 0 : index
    %2 = vector.load %arg3[%c0_2, %c0_3] : memref<32x128xf32, #tpu.memory_space<vmem>>, vector<32x128xf32>
    %cst = arith.constant dense<0.000000e+00> : vector<8x128xf32>
    %3 = tpu.matmul %1, %2, %cst {dimension_numbers = #tpu.dot_dimension_numbers<[1], [0], [0], [1], [0, 0, 1, 1], [], []>} : vector<8x32xf32>, vector<32x128xf32>, vector<8x128xf32> -> vector<8x128xf32>
    %c0_4 = arith.constant 0 : index
    %c0_5 = arith.constant 0 : index
    %c0_6 = arith.constant 0 : index
    %4 = vector.load %arg4[%c0_4, %c0_5, %c0_6] : memref<1x8x128xf32, #tpu.memory_space<vmem>>, vector<1x8x128xf32>
    %5 = vector.shape_cast %4 : vector<1x8x128xf32> to vector<8x128xf32>
    %6 = vector.shape_cast %3 : vector<8x128xf32> to vector<1x8x128xf32>
    tpu.vector_store %arg4[%c0_4, %c0_5, %c0_6], %6 {strides = array<i32>} : memref<1x8x128xf32, #tpu.memory_space<vmem>>, vector<1x8x128xf32>,
    %7 = arith.mulf %3, %3 : vector<8x128xf32>
    %cst_7 = arith.constant dense<0.000000e+00> : vector<8xf32>
    %8 = vector.multi_reduction <add>, %7, %cst_7 [1] : vector<8x128xf32> to vector<8xf32>
    %9 = vector.shape_cast %8 : vector<8xf32> to vector<8x1xf32>
    %c0_8 = arith.constant 0 : index
    %c0_9 = arith.constant 0 : index
    %c0_10 = arith.constant 0 : index
    %10 = vector.load %arg5[%c0_8, %c0_9, %c0_10] : memref<1x8x1xf32, #tpu.memory_space<vmem>>, vector<1x8x1xf32>
    %11 = vector.shape_cast %10 : vector<1x8x1xf32> to vector<8x1xf32>
    %12 = vector.shape_cast %9 : vector<8x1xf32> to vector<1x8x1xf32>
    tpu.vector_store %arg5[%c0_8, %c0_9, %c0_10], %12 {strides = array<i32>} : memref<1x8x1xf32, #tpu.memory_space<vmem>>, vector<1x8x1xf32>,
    return
  }
  func.func @transform_0(%arg0: i32, %arg1: i32) -> (i32, i32, i32) {
    %c0_i32 = arith.constant 0 : i32
    %c0_i32_0 = arith.constant 0 : i32
    return %arg0, %arg1, %c0_i32 : i32, i32, i32
  }
  func.func @transform_1(%arg0: i32, %arg1: i32) -> (i32, i32) {
    %c0_i32 = arith.constant 0 : i32
    %c0_i32_0 = arith.constant 0 : i32
    %c0_i32_1 = arith.constant 0 : i32
    return %c0_i32, %c0_i32_0 : i32, i32
  }
  func.func @transform_2(%arg0: i32, %arg1: i32) -> (i32, i32, i32) {
    %c0_i32 = arith.constant 0 : i32
    %c0_i32_0 = arith.constant 0 : i32
    return %arg0, %arg1, %c0_i32 : i32, i32, i32
  }
  func.func @transform_3(%arg0: i32, %arg1: i32) -> (i32, i32, i32) {
    %c0_i32 = arith.constant 0 : i32
    %c0_i32_0 = arith.constant 0 : i32
    return %arg0, %arg1, %c0_i32 : i32, i32, i32
  }
}

module attributes {stable_mosaic.version = 11 : i64} {
  func.func @_project_kernel(%arg0: i32, %arg1: i32, %arg2: memref<1x8x32xf32, #tpu.memory_space<vmem>>, %arg3: memref<32x128xf32, #tpu.memory_space<vmem>>, %arg4: memref<1x8x128xf32, #tpu.memory_space<vmem>>, %arg5: memref<1x8x1xf32, #tpu.memory_space<vmem>>) attributes {dimension_semantics = [#tpu.dimension_semantics<parallel>, #tpu.dimension_semantics<parallel>], iteration_bounds = array<i64: 2, 1>, scalar_prefetch = 0 : i64, scratch_operands = 0 : i64, tpu.core_type = #tpu.core_type<tc>, window_params = [{transform_indices = @transform_0, window_bounds = array<i64: 1, 8, 32>}, {pipeline_mode = #tpu.pipeline_mode<synchronous>, transform_indices = @transform_1, window_bounds = array<i64: 32, 128>}, {transform_indices = @transform_2, window_bounds = array<i64: 1, 8, 128>}, {transform_indices = @transform_3, window_bounds = array<i64: 1, 8, 1>}]} {
    %c0 = arith.constant 0 : index
    %c0_0 = arith.constant 0 : index
    %c0_1 = arith.constant 0 : index
    %0 = vector.load %arg2[%c0, %c0_0, %c0_1] : memref<1x8x32xf32, #tpu.memory_space<vmem>>, vector<1x8x32xf32>
    %1 = vector.shape_cast %0 : vector<1x8x32xf32> to vector<8x32xf32>
    %c0_2 = arith.constant 0 : index
    %c0_3 = arith.constant 0 : index
    %2 = vector.load %arg3[%c0_2, %c0_3] : memref<32x128xf32, #tpu.memory_space<vmem>>, vector<32x128xf32>
    %cst = arith.constant dense<0.000000e+00> : vector<8x128xf32>
    %3 = tpu.matmul %1, %2, %cst {dimension_numbers = #tpu.dot_dimension_numbers<[1], [0], [0], [1], [0, 0, 1, 1], [], []>} : vector<8x32xf32>, vector<32x128xf32>, vector<8x128xf32> -> vector<8x128xf32>
    %c0_4 = arith.constant 0 : index
    %c0_5 = arith.constant 0 : index
    %c0_6 = arith.constant 0 : index
    %4 = vector.load %arg4[%c0_4, %c0_5, %c0_6] : memref<1x8x128xf32, #tpu.memory_space<vmem>>, vector<1x8x128xf32>
    %5 = vector.shape_cast %4 : vector<1x8x128xf32> to vector<8x128xf32>
    %6 = vector.shape_cast %3 : vector<8x128xf32> to vector<1x8x128xf32>
    tpu.vector_store %arg4[%c0_4, %c0_5, %c0_6], %6 {strides = array<i32>} : memref<1x8x128xf32, #tpu.memory_space<vmem>>, vector<1x8x128xf32>,
    %7 = arith.mulf %3, %3 : vector<8x128xf32>
    %cst_7 = arith.constant dense<0.000000e+00> : vector<8xf32>
    %8 = vector.multi_reduction <add>, %7, %cst_7 [1] : vector<8x128xf32> to vector<8xf32>
    %9 = vector.shape_cast %8 : vector<8xf32> to vector<8x1xf32>
    %c0_8 = arith.constant 0 : index
    %c0_9 = arith.constant 0 : index
    %c0_10 = arith.constant 0 : index
    %10 = vector.load %arg5[%c0_8, %c0_9, %c0_10] : memref<1x8x1xf32, #tpu.memory_space<vmem>>, vector<1x8x1xf32>
    %11 = vector.shape_cast %10 : vector<1x8x1xf32> to vector<8x1xf32>
    %12 = vector.shape_cast %9 : vector<8x1xf32> to vector<1x8x1xf32>
    tpu.vector_store %arg5[%c0_8, %c0_9, %c0_10], %12 {strides = array<i32>} : memref<1x8x1xf32, #tpu.memory_space<vmem>>, vector<1x8x1xf32>,
    return
  }
  func.func @transform_0(%arg0: i32, %arg1: i32) -> (i32, i32, i32) {
    %c0_i32 = arith.constant 0 : i32
    %c0_i32_0 = arith.constant 0 : i32
    return %arg0, %arg1, %c0_i32 : i32, i32, i32
  }
  func.func @transform_1(%arg0: i32, %arg1: i32) -> (i32, i32) {
    %c0_i32 = arith.constant 0 : i32
    %c0_i32_0 = arith.constant 0 : i32
    %c0_i32_1 = arith.constant 0 : i32
    return %c0_i32, %c0_i32_0 : i32, i32
  }
  func.func @transform_2(%arg0: i32, %arg1: i32) -> (i32, i32, i32) {
    %c0_i32 = arith.constant 0 : i32
    %c0_i32_0 = arith.constant 0 : i32
    return %arg0, %arg1, %c0_i32 : i32, i32, i32
  }
  func.func @transform_3(%arg0: i32, %arg1: i32) -> (i32, i32, i32) {
    %c0_i32 = arith.constant 0 : i32
    %c0_i32_0 = arith.constant 0 : i32
    return %arg0, %arg1, %c0_i32 : i32, i32, i32
  }
}

</mosaic_0001>

<bundles_post_ra>
// kernel: tpu_custom_call.1
= control target key start
LH: loop header
LB: loop body
LE: loop exit
PB: predicated region body
PF: predicated region fallthrough
CT: control target
= control target key end

     0   :  { %9 = vsyncpa [#allocation3], 0  ;;  %s971_s0 = inlined_call_operand.hbm [shape: f32[2,8,32], index: 0, kind: input, shape index: {}]   ;;  %s972_s1 = inlined_call_operand.hbm [shape: f32[32,128], index: 1, kind: input, shape index: {}]   ;;  %s973_s2 = inlined_call_operand.hbm [shape: f32[2,8,128], index: 2, kind: output, shape index: {0}]   ;;  %s974_s3 = inlined_call_operand.vmem [shape: f32[2,8,1], index: 3, kind: output, shape index: {1}]  }
   0x1   :  { %11 = vsyncpa [#allocation3 + $0x1], 0 }
   0x2   :  { %12 = vsyncpa [#allocation6], 0 }
   0x3   :  { %13 = vsyncpa [#allocation4], 0 }
   0x4   :  { %15 = vsyncpa [#allocation4 + $0x1], 0  ;;  %s759_s12 = smov 0   ;;  %s761_s13 = smov 0  }
   0x5   :  { %s763_s14 = smov 0   ;;  %s765_s15 = smov 0  }
   0x6   :  { %s767_s16 = smov 0   ;;  %s769_s17 = smov 0  }
   0x7 LB: > { %s468_s18 = sadd.s32 4294967295, %s729_s17   ;;  %s469_s19 = sadd.s32 4294967294, %s729_s17   ;;  %s729_s17 = sphi %s769_s17, %s21_s17   ;;  %s725_s16 = sphi %s767_s16, %s998_s16   ;;  %s721_s15 = sphi %s765_s15, %s997_s15   ;;  %s717_s14 = sphi %s763_s14, %s996_s14   ;;  %s713_s13 = sphi %s761_s13, %s995_s13   ;;  %s709_s12 = sphi %s759_s12, %s994_s12  }
   0x8   : > { %p55_p0 = scmp.ne.s32.totalorder %s713_s13, %s709_s12  ;;  %p793_p1 = scmp.eq.s32.totalorder %s468_s18, 0 }
   0x9   : > { %p797_p2 = scmp.eq.s32.totalorder %s468_s18, 1  ;;  %p108_p3 = scmp.eq.s32.totalorder %s469_s19, 1 }
   0xa   : > { %s979_s20 = scalar_select %p793_p1, 1, 0 }
   0xb   : > { %s980_s21 = scalar_select %p797_p2, 1, 0 }
   0xc   : > { %p803_p4 = por %p793_p1, %p55_p0  ;;  %p470_p5 = scmp.ge.s32.totalorder %s729_s17, 1 }
   0xd   : > { %p808_p6 = por %p108_p3, %p55_p0  ;;  %p143_p7 = scmp.lt.s32.totalorder %s729_s17, 3 }
   0xe   : > { %s981_s22 = scalar_select %p803_p4, 1, 0 }
   0xf   : > { %s982_s23 = scalar_select %p808_p6, 1, 0 }
  0x10   : > { %p813_p8 = pnand %p470_p5, %p143_p7  ;;  %s731_s25 = smov [#allocation5]  }
  0x11   : > { %s155_s26 = sshll.u32 %s731_s25, 4  ;;  %s33_s28 = sadd.s32 1, %s725_s16  ;;  %s156_s26 = int_to_ptr.vmem [resolvable:$true] %s155_s26 }
  0x12   : > { %s983_s24 = scalar_select %p813_p8, 1, 0 }
  0x13   : > { %p515_p9 = pneg %p813_p8  ;;  %s585_s4 = scalar_lea.hbm %s972_s1, 512 }
  0x14   : > { %p586_p12 = scmp.ne.s32.totalorder %s972_s1, %s585_s4  ;;  %p592_p5 = scmp.lt.u32.totalorder %s585_s4, %s972_s1 }
  0x15   : > { %p822_p11 = pnand %p515_p9, %p793_p1 }
  0x17   : > { %p587_p13 = pneg %p822_p11 }
  0x19   : > { %p588_p0 = pnand %p587_p13, %p586_p12 }
  0x1b   : > { %p589_p3 = pneg %p588_p0 }
  0x1d   : > { %p594_p7 = pnand %p592_p5, %p589_p3 }
  0x1f   : > { %597 = shalt.err (!%p594_p7)
}
  0x20   : > { %s598_s9 = scalar_lea.vmem %s156_s26, 512  ;;  %p606_p1 = scmp.lt.s32.totalorder %s156_s26, %s156_s26 }
  0x21   : > { %p599_p9 = scmp.ne.s32.totalorder %s156_s26, %s598_s9  ;;  %p607_p4 = scmp.lt.s32.totalorder %s598_s9, %s598_s9 }
  0x23   : > { %p601_p10 = pnand %p599_p9, %p587_p13  ;;  %p608_p8 = por %p607_p4, %p606_p1 }
  0x25   : > { %p602_p6 = pneg %p601_p10 }
  0x27   : > { %p609_p2 = pnand %p608_p8, %p602_p6 }
  0x29   : > { %612 = shalt.err (!%p609_p2)
}
  0x2a   : > { %s732_s10 = smov 128   ;;  %s733_s11 = smov 8  }
  0x2b   : > { %518 = dma.hbm_to_vmem [thread:$0]  (!%p822_p11), %s972_s1, 512, %s156_s26, [#allocation6], %s732_s10, %s732_s10, %s733_s11  }
  0x2c   : > { %p35_p1 = scmp.ge.s32.totalorder %s33_s28, 2  ;;  %s42_s25 = sadd.s32 1, %s717_s14 }
  0x2d   : > { %p49_p2 = scmp.ne.s32.totalorder %s717_s14, %s713_s13  ;;  %p50_p4 = scmp.eq.s32.totalorder %s729_s17, 0 }
  0x2e   : > { %s1000_s28 = smov (%p35_p1, %s33_s28), 0  ;;  %p986_p8 = scmp.ne.s32.totalorder %s980_s21, 0 }
  0x2f   : > { %p849_p6 = por %p50_p4, %p49_p2  ;;  %s37_s27 = ssub.s32 %s725_s16, %s1000_s28 }
  0x30   : > { %p855_p10 = por %p986_p8, %p49_p2  ;;  %p528_p12 = scmp.lt.s32.totalorder %s729_s17, 2 }
  0x31   : > { %p40_p11 = scmp.eq.s32.totalorder %s37_s27, 0  ;;  %s169_s26 = sand.u32 1, %s717_s14  }
  0x32   : > { %s473_s4 = sshll.u32 %s169_s26, 3  ;;  %s474_s6 = sshll.u32 %s725_s16, 7 }
  0x33   : > { %s864_s5 = scalar_select %p40_p11, %s717_s14, %s42_s25  }
  0x34   : > { %s870_s9 = scalar_lea.hbm %s971_s0, %s474_s6  ;;  %s173_s21 = scalar_lea.vmem [#allocation2], %s473_s4 }
  0x35   : > { %s181_s10 = sshll.u32 %s173_s21, 4  ;;  %p876_p13 = pnand %p528_p12, %p849_p6  ;;  %s872_s10 = int_to_ptr.vmem [resolvable:$true] %s181_s10 }
  0x36   : > { %s170_s18 = scalar_lea.sflag [#allocation3], %s169_s26  ;;  %s613_s19 = scalar_lea.hbm %s870_s9, 128 }
  0x37   : > { %p614_p0 = scmp.ne.s32.totalorder %s870_s9, %s613_s19  ;;  %p615_p3 = pneg %p876_p13 }
  0x38   : > { %s618_s4 = scalar_lea.hbm %s971_s0, 256  ;;  %p619_p9 = scmp.lt.u32.totalorder %s870_s9, %s971_s0 }
  0x39   : > { %p616_p5 = pnand %p615_p3, %p614_p0  ;;  %p620_p1 = scmp.lt.u32.totalorder %s618_s4, %s613_s19 }
  0x3a   : > { %p622_p4 = scmp.lt.u32.totalorder %s613_s19, %s870_s9 }
  0x3b   : > { %p617_p7 = pneg %p616_p5  ;;  %p621_p2 = por %p620_p1, %p619_p9 }
  0x3d   : > { %p623_p6 = por %p622_p4, %p621_p2 }
  0x3f   : > { %p624_p8 = pnand %p623_p6, %p617_p7 }
  0x41   : > { %627 = shalt.err (!%p624_p8)
}
  0x42   : > { %s628_s26 = scalar_lea.vmem %s872_s10, 128  ;;  %s734_s7 = smov [#allocation2]  }
  0x43   : > { %p629_p12 = scmp.ne.s32.totalorder %s872_s10, %s628_s26  ;;  %s633_s8 = sshll.u32 %s734_s7, 4  ;;  %s634_s8 = int_to_ptr.vmem [resolvable:$false] %s633_s8 }
  0x44   : > { %s635_s21 = scalar_lea.vmem %s634_s8, 256  ;;  %p636_p5 = scmp.lt.s32.totalorder %s872_s10, %s634_s8 }
  0x45   : > { %p631_p11 = pnand %p629_p12, %p615_p3  ;;  %p637_p9 = scmp.lt.s32.totalorder %s635_s21, %s628_s26 }
  0x47   : > { %p632_p0 = pneg %p631_p11  ;;  %p638_p1 = por %p637_p9, %p636_p5 }
  0x49   : > { %p639_p2 = pnand %p638_p1, %p632_p0 }
  0x4b   : > { %642 = shalt.err (!%p639_p2)
}
  0x4c   : > { %522 = dma.hbm_to_vmem [thread:$0]  (!%p876_p13), %s870_s9, 128, %s872_s10, %s170_s18  }
  0x4d   : > { %p989_p7 = scmp.ne.s32.totalorder %s983_s24, 0 }
  0x4e   : > { %s908_s19 = sand.u32 (!%p989_p7), 1, %s713_s13   ;;  %p990_p3 = scmp.ne.s32.totalorder (!%p989_p7), %s981_s22, 0 }
  0x4f   : > { %190 = sbr.rel (%p989_p7) target bundleno = 458 (0x1ca), region = 28  ;;  %s476_s25 = sshll.u32 (!%p989_p7), %s908_s19, 3 }
  0x50   : > { %s193_s27 = scalar_lea.sflag (!%p989_p7), [#allocation3], %s908_s19  ;;  %s196_s4 = scalar_lea.vmem (!%p989_p7), [#allocation2], %s476_s25 }
  0x56   : > { %696 = dma.done.wait (%p990_p3), %s193_s27, 128  }
  0x57   : > { %698 = vsyncadd (%p990_p3), %s193_s27, 4294967168  ;;  %p991_p4 = scmp.ne.s32.totalorder %s979_s20, 0 }
  0x59   : > { %700 = dma.done.wait (%p991_p4), [#allocation6], 512  }
  0x5a   : > { %702 = vsyncadd (%p991_p4), [#allocation6], 4294966784  ;;  %v735_v0 = vmov 0.0|0.0   ;;  %vm736_vm0 = vmmov 0   ;;  %v737_v1 = vmov 0.0   ;;  %v238_v2 = vld [vmem:[#allocation5] sm:$0xff] }
  0x5b   : > { %501 = vmatprep.subr.bf16.mxu0 %v735_v0  ;;  %498 = vmatprep.mubr.msk.f32.mxu0 %vm736_vm0, %v737_v1  ;;  %v239_v3 = vld [vmem:[#allocation5 + $0x8] sm:$0xff]  ;;  %v240_v4 = vld [vmem:[#allocation5 + $0x10] sm:$0xff]  ;;  %v241_v6 = vld [vmem:[#allocation5 + $0x18] sm:$0xff]  ;;  %vm242_vm1 = vcmask 261120   ;;  %s220_s20 = scalar_lea.vmem [#allocation7], %s476_s25  ;;  %s482_s24 = sshll.u32 %s721_s15, 7 }
  0x5c   : > { %v502_v5 = vpack.c.bf16 %v239_v3, %v238_v2  ;;  %v505_v7 = vpack.c.bf16 %v241_v6, %v240_v4  ;;  %v237_v8 = vld [vmem:[%s196_s4] sm:$0xff]  ;;  %s344_s22 = sshll.u32 %s220_s20, 4  ;;  %s342_s11 = scalar_lea.hbm %s973_s2, %s482_s24  ;;  %s920_s22 = int_to_ptr.vmem [resolvable:$true] %s344_s22 }
  0x5d   : > { %s323_s18 = scalar_lea.sflag [#allocation4], %s908_s19  ;;  %s643_s29 = scalar_lea.vmem %s920_s22, 128 }
  0x5e   : > { %503 = vmatpush3.bf16.msra.mxu0 %v502_v5  ;;  %p644_p13 = scmp.ne.s32.totalorder %s920_s22, %s643_s29  ;;  %s738_s6 = smov [#allocation7]  }
  0x5f   : > { %504 = vmatprep.subr.bf16.mxu0 %v735_v0  ;;  %s647_s26 = sshll.u32 %s738_s6, 4  ;;  %s648_s26 = int_to_ptr.vmem [resolvable:$false] %s647_s26 }
  0x60   : > { %p645_p6 = pnand %p644_p13, %p855_p10  ;;  %s649_s7 = scalar_lea.vmem %s648_s26, 256 }
  0x61   : > { %p650_p12 = scmp.lt.s32.totalorder %s920_s22, %s648_s26  ;;  %p651_p11 = scmp.lt.s32.totalorder %s649_s7, %s643_s29 }
  0x62   : > { %506 = vmatpush3.bf16.msra.mxu0 %v505_v7  ;;  %p646_p8 = pneg %p645_p6 }
  0x63   : > { %p652_p0 = por %p651_p11, %p650_p12 }
  0x65   : > { %499 = vmatmul.mubr.msk.f32.vlgmr.msra.gmra.mrb[0].mxu0 %vm242_vm1, %v237_v8  ;;  %p653_p5 = pnand %p652_p0, %p646_p8 }
 0x138   : > { %v312_v9 = vpop.f32.mrb[0].mxu0 }
 0x139   : > { %316 = vst [vmem:[%s220_s20] sm:$0xff] %v312_v9  ;;  %v500_v10 = vpop.f32.mrb[1].mxu0  ;;  %v317_v11 = vmul.f32 %v312_v9, %v312_v9 }
 0x13b   : > { %318 = vadd.xlane.f32.xlu0 %v317_v11 }
 0x13c   : > { %656 = shalt.err (!%p653_p5)
}
 0x13d   : > { %s657_s8 = scalar_lea.hbm %s342_s11, 128  ;;  %s661_s25 = scalar_lea.hbm %s973_s2, 256 }
 0x13e   : > { %p658_p9 = scmp.ne.s32.totalorder %s342_s11, %s657_s8  ;;  %p662_p7 = scmp.lt.u32.totalorder %s342_s11, %s973_s2 }
 0x13f   : > { %p663_p3 = scmp.lt.u32.totalorder %s661_s25, %s657_s8  ;;  %p665_p13 = scmp.lt.u32.totalorder %s657_s8, %s342_s11 }
 0x140   : > { %p659_p1 = pnand %p658_p9, %p855_p10 }
 0x141   : > { %p664_p4 = por %p663_p3, %p662_p7 }
 0x142   : > { %p660_p2 = pneg %p659_p1 }
 0x143   : > { %p666_p6 = por %p665_p13, %p664_p4 }
 0x145   : > { %p667_p8 = pnand %p666_p6, %p660_p2 }
 0x147   : > { %670 = shalt.err (!%p667_p8)
}
 0x148   : > { %513 = dma.vmem_to_hbm [thread:$0]  (%p855_p10), %s920_s22, 128, %s342_s11, %s323_s18   ;;  %vm320_vm2 = vcmask 7168  }
 0x149   : > { %p230_p12 = scmp.lt.s32.totalorder %s721_s15, 1 }
 0x14b   : > { %s1002_s15 = smov (!%p230_p12, %s721_s15), 1 }
 0x14c   : > { %s479_s20 = sshll.u32 %s1002_s15, 3 }
 0x14d   : > { %s236_s10 = scalar_lea.vmem %s974_s3, %s479_s20 }
 0x1c8   : > { %v319_v12 = vpop.xlane.xlu0 %318 }
 0x1c9   : > { %321 = vst.msk [vmem:[%s236_s10] sm:$0xff] %vm320_vm2, %v319_v12 }
 0x1ca PF: > { %s359_s29 = sand.u32 1, %s709_s12   ;;  %p992_p11 = scmp.ne.s32.totalorder %s982_s23, 0 }
 0x1cb   : > { %p993_p0 = scmp.ge.s32.totalorder %s729_s17, 2  ;;  %s360_s30 = scalar_lea.sflag [#allocation4], %s359_s29 }
 0x1cd   : > { %p524_p5 = pnand %p993_p0, %p992_p11 }
 0x1cf   : > { %704 = dma.done.wait (!%p524_p5), %s360_s30, 128  }
 0x1d0   : > { %706 = vsyncadd (!%p524_p5), %s360_s30, 4294967168  ;;  %s21_s17 = sadd.s32 1, %s729_s17   ;;  %s994_s12 = smov %s713_s13 }
 0x1d1   : > { %p18_p10 = scmp.ge.s32.totalorder %s21_s17, 4   ;;  %s995_s13 = smov %s717_s14 }
 0x1d2   : > { %s996_s14 = smov %s864_s5  ;;  %s997_s15 = smov %s725_s16 }
 0x1d3   : > { %s998_s16 = smov %s1000_s28  ;;  %20 = sbr.rel (!%p18_p10) target bundleno = 7 (0x7), region = 89 }
 0x1da   :  { %375 = vsyncpa [#allocation3], 1 }
 0x1db   :  { %377 = vsyncpa [#allocation3 + $0x1], 1 }
 0x1dc   :  { %378 = vsyncpa [#allocation6], 1 }
 0x1dd   :  { %379 = vsyncpa [#allocation4], 1 }
 0x1de   :  { %381 = vsyncpa [#allocation4 + $0x1], 1 }

// kernel: tpu_custom_call.1
= control target key start
LH: loop header
LB: loop body
LE: loop exit
PB: predicated region body
PF: predicated region fallthrough
CT: control target
= control target key end

     0   :  { %9 = vsyncpa [#allocation3], 0  ;;  %s971_s0 = inlined_call_operand.hbm [shape: f32[2,8,32], index: 0, kind: input, shape index: {}]   ;;  %s972_s1 = inlined_call_operand.hbm [shape: f32[32,128], index: 1, kind: input, shape index: {}]   ;;  %s973_s2 = inlined_call_operand.hbm [shape: f32[2,8,128], index: 2, kind: output, shape index: {0}]   ;;  %s974_s3 = inlined_call_operand.vmem [shape: f32[2,8,1], index: 3, kind: output, shape index: {1}]  }
   0x1   :  { %11 = vsyncpa [#allocation3 + $0x1], 0 }
   0x2   :  { %12 = vsyncpa [#allocation6], 0 }
   0x3   :  { %13 = vsyncpa [#allocation4], 0 }
   0x4   :  { %15 = vsyncpa [#allocation4 + $0x1], 0  ;;  %s759_s12 = smov 0   ;;  %s761_s13 = smov 0  }
   0x5   :  { %s763_s14 = smov 0   ;;  %s765_s15 = smov 0  }
   0x6   :  { %s767_s16 = smov 0   ;;  %s769_s17 = smov 0  }
   0x7 LB: > { %s468_s18 = sadd.s32 4294967295, %s729_s17   ;;  %s469_s19 = sadd.s32 4294967294, %s729_s17   ;;  %s729_s17 = sphi %s769_s17, %s21_s17   ;;  %s725_s16 = sphi %s767_s16, %s998_s16   ;;  %s721_s15 = sphi %s765_s15, %s997_s15   ;;  %s717_s14 = sphi %s763_s14, %s996_s14   ;;  %s713_s13 = sphi %s761_s13, %s995_s13   ;;  %s709_s12 = sphi %s759_s12, %s994_s12  }
   0x8   : > { %p55_p0 = scmp.ne.s32.totalorder %s713_s13, %s709_s12  ;;  %p793_p1 = scmp.eq.s32.totalorder %s468_s18, 0 }
   0x9   : > { %p797_p2 = scmp.eq.s32.totalorder %s468_s18, 1  ;;  %p108_p3 = scmp.eq.s32.totalorder %s469_s19, 1 }
   0xa   : > { %s979_s20 = scalar_select %p793_p1, 1, 0 }
   0xb   : > { %s980_s21 = scalar_select %p797_p2, 1, 0 }
   0xc   : > { %p803_p4 = por %p793_p1, %p55_p0  ;;  %p470_p5 = scmp.ge.s32.totalorder %s729_s17, 1 }
   0xd   : > { %p808_p6 = por %p108_p3, %p55_p0  ;;  %p143_p7 = scmp.lt.s32.totalorder %s729_s17, 3 }
   0xe   : > { %s981_s22 = scalar_select %p803_p4, 1, 0 }
   0xf   : > { %s982_s23 = scalar_select %p808_p6, 1, 0 }
  0x10   : > { %p813_p8 = pnand %p470_p5, %p143_p7  ;;  %s731_s25 = smov [#allocation5]  }
  0x11   : > { %s155_s26 = sshll.u32 %s731_s25, 4  ;;  %s33_s28 = sadd.s32 1, %s725_s16  ;;  %s156_s26 = int_to_ptr.vmem [resolvable:$true] %s155_s26 }
  0x12   : > { %s983_s24 = scalar_select %p813_p8, 1, 0 }
  0x13   : > { %p515_p9 = pneg %p813_p8  ;;  %s585_s4 = scalar_lea.hbm %s972_s1, 512 }
  0x14   : > { %p586_p12 = scmp.ne.s32.totalorder %s972_s1, %s585_s4  ;;  %p592_p5 = scmp.lt.u32.totalorder %s585_s4, %s972_s1 }
  0x15   : > { %p822_p11 = pnand %p515_p9, %p793_p1 }
  0x17   : > { %p587_p13 = pneg %p822_p11 }
  0x19   : > { %p588_p0 = pnand %p587_p13, %p586_p12 }
  0x1b   : > { %p589_p3 = pneg %p588_p0 }
  0x1d   : > { %p594_p7 = pnand %p592_p5, %p589_p3 }
  0x1f   : > { %597 = shalt.err (!%p594_p7)
}
  0x20   : > { %s598_s9 = scalar_lea.vmem %s156_s26, 512  ;;  %p606_p1 = scmp.lt.s32.totalorder %s156_s26, %s156_s26 }
  0x21   : > { %p599_p9 = scmp.ne.s32.totalorder %s156_s26, %s598_s9  ;;  %p607_p4 = scmp.lt.s32.totalorder %s598_s9, %s598_s9 }
  0x23   : > { %p601_p10 = pnand %p599_p9, %p587_p13  ;;  %p608_p8 = por %p607_p4, %p606_p1 }
  0x25   : > { %p602_p6 = pneg %p601_p10 }
  0x27   : > { %p609_p2 = pnand %p608_p8, %p602_p6 }
  0x29   : > { %612 = shalt.err (!%p609_p2)
}
  0x2a   : > { %s732_s10 = smov 128   ;;  %s733_s11 = smov 8  }
  0x2b   : > { %518 = dma.hbm_to_vmem [thread:$0]  (!%p822_p11), %s972_s1, 512, %s156_s26, [#allocation6], %s732_s10, %s732_s10, %s733_s11  }
  0x2c   : > { %p35_p1 = scmp.ge.s32.totalorder %s33_s28, 2  ;;  %s42_s25 = sadd.s32 1, %s717_s14 }
  0x2d   : > { %p49_p2 = scmp.ne.s32.totalorder %s717_s14, %s713_s13  ;;  %p50_p4 = scmp.eq.s32.totalorder %s729_s17, 0 }
  0x2e   : > { %s1000_s28 = smov (%p35_p1, %s33_s28), 0  ;;  %p986_p8 = scmp.ne.s32.totalorder %s980_s21, 0 }
  0x2f   : > { %p849_p6 = por %p50_p4, %p49_p2  ;;  %s37_s27 = ssub.s32 %s725_s16, %s1000_s28 }
  0x30   : > { %p855_p10 = por %p986_p8, %p49_p2  ;;  %p528_p12 = scmp.lt.s32.totalorder %s729_s17, 2 }
  0x31   : > { %p40_p11 = scmp.eq.s32.totalorder %s37_s27, 0  ;;  %s169_s26 = sand.u32 1, %s717_s14  }
  0x32   : > { %s473_s4 = sshll.u32 %s169_s26, 3  ;;  %s474_s6 = sshll.u32 %s725_s16, 7 }
  0x33   : > { %s864_s5 = scalar_select %p40_p11, %s717_s14, %s42_s25  }
  0x34   : > { %s870_s9 = scalar_lea.hbm %s971_s0, %s474_s6  ;;  %s173_s21 = scalar_lea.vmem [#allocation2], %s473_s4 }
  0x35   : > { %s181_s10 = sshll.u32 %s173_s21, 4  ;;  %p876_p13 = pnand %p528_p12, %p849_p6  ;;  %s872_s10 = int_to_ptr.vmem [resolvable:$true] %s181_s10 }
  0x36   : > { %s170_s18 = scalar_lea.sflag [#allocation3], %s169_s26  ;;  %s613_s19 = scalar_lea.hbm %s870_s9, 128 }
  0x37   : > { %p614_p0 = scmp.ne.s32.totalorder %s870_s9, %s613_s19  ;;  %p615_p3 = pneg %p876_p13 }
  0x38   : > { %s618_s4 = scalar_lea.hbm %s971_s0, 256  ;;  %p619_p9 = scmp.lt.u32.totalorder %s870_s9, %s971_s0 }
  0x39   : > { %p616_p5 = pnand %p615_p3, %p614_p0  ;;  %p620_p1 = scmp.lt.u32.totalorder %s618_s4, %s613_s19 }
  0x3a   : > { %p622_p4 = scmp.lt.u32.totalorder %s613_s19, %s870_s9 }
  0x3b   : > { %p617_p7 = pneg %p616_p5  ;;  %p621_p2 = por %p620_p1, %p619_p9 }
  0x3d   : > { %p623_p6 = por %p622_p4, %p621_p2 }
  0x3f   : > { %p624_p8 = pnand %p623_p6, %p617_p7 }
  0x41   : > { %627 = shalt.err (!%p624_p8)
}
  0x42   : > { %s628_s26 = scalar_lea.vmem %s872_s10, 128  ;;  %s734_s7 = smov [#allocation2]  }
  0x43   : > { %p629_p12 = scmp.ne.s32.totalorder %s872_s10, %s628_s26  ;;  %s633_s8 = sshll.u32 %s734_s7, 4  ;;  %s634_s8 = int_to_ptr.vmem [resolvable:$false] %s633_s8 }
  0x44   : > { %s635_s21 = scalar_lea.vmem %s634_s8, 256  ;;  %p636_p5 = scmp.lt.s32.totalorder %s872_s10, %s634_s8 }
  0x45   : > { %p631_p11 = pnand %p629_p12, %p615_p3  ;;  %p637_p9 = scmp.lt.s32.totalorder %s635_s21, %s628_s26 }
  0x47   : > { %p632_p0 = pneg %p631_p11  ;;  %p638_p1 = por %p637_p9, %p636_p5 }
  0x49   : > { %p639_p2 = pnand %p638_p1, %p632_p0 }
  0x4b   : > { %642 = shalt.err (!%p639_p2)
}
  0x4c   : > { %522 = dma.hbm_to_vmem [thread:$0]  (!%p876_p13), %s870_s9, 128, %s872_s10, %s170_s18  }
  0x4d   : > { %p989_p7 = scmp.ne.s32.totalorder %s983_s24, 0 }
  0x4e   : > { %s908_s19 = sand.u32 (!%p989_p7), 1, %s713_s13   ;;  %p990_p3 = scmp.ne.s32.totalorder (!%p989_p7), %s981_s22, 0 }
  0x4f   : > { %190 = sbr.rel (%p989_p7) target bundleno = 458 (0x1ca), region = 28  ;;  %s476_s25 = sshll.u32 (!%p989_p7), %s908_s19, 3 }
  0x50   : > { %s193_s27 = scalar_lea.sflag (!%p989_p7), [#allocation3], %s908_s19  ;;  %s196_s4 = scalar_lea.vmem (!%p989_p7), [#allocation2], %s476_s25 }
  0x56   : > { %696 = dma.done.wait (%p990_p3), %s193_s27, 128  }
  0x57   : > { %698 = vsyncadd (%p990_p3), %s193_s27, 4294967168  ;;  %p991_p4 = scmp.ne.s32.totalorder %s979_s20, 0 }
  0x59   : > { %700 = dma.done.wait (%p991_p4), [#allocation6], 512  }
  0x5a   : > { %702 = vsyncadd (%p991_p4), [#allocation6], 4294966784  ;;  %v735_v0 = vmov 0.0|0.0   ;;  %vm736_vm0 = vmmov 0   ;;  %v737_v1 = vmov 0.0   ;;  %v238_v2 = vld [vmem:[#allocation5] sm:$0xff] }
  0x5b   : > { %501 = vmatprep.subr.bf16.mxu0 %v735_v0  ;;  %498 = vmatprep.mubr.msk.f32.mxu0 %vm736_vm0, %v737_v1  ;;  %v239_v3 = vld [vmem:[#allocation5 + $0x8] sm:$0xff]  ;;  %v240_v4 = vld [vmem:[#allocation5 + $0x10] sm:$0xff]  ;;  %v241_v6 = vld [vmem:[#allocation5 + $0x18] sm:$0xff]  ;;  %vm242_vm1 = vcmask 261120   ;;  %s220_s20 = scalar_lea.vmem [#allocation7], %s476_s25  ;;  %s482_s24 = sshll.u32 %s721_s15, 7 }
  0x5c   : > { %v502_v5 = vpack.c.bf16 %v239_v3, %v238_v2  ;;  %v505_v7 = vpack.c.bf16 %v241_v6, %v240_v4  ;;  %v237_v8 = vld [vmem:[%s196_s4] sm:$0xff]  ;;  %s344_s22 = sshll.u32 %s220_s20, 4  ;;  %s342_s11 = scalar_lea.hbm %s973_s2, %s482_s24  ;;  %s920_s22 = int_to_ptr.vmem [resolvable:$true] %s344_s22 }
  0x5d   : > { %s323_s18 = scalar_lea.sflag [#allocation4], %s908_s19  ;;  %s643_s29 = scalar_lea.vmem %s920_s22, 128 }
  0x5e   : > { %503 = vmatpush3.bf16.msra.mxu0 %v502_v5  ;;  %p644_p13 = scmp.ne.s32.totalorder %s920_s22, %s643_s29  ;;  %s738_s6 = smov [#allocation7]  }
  0x5f   : > { %504 = vmatprep.subr.bf16.mxu0 %v735_v0  ;;  %s647_s26 = sshll.u32 %s738_s6, 4  ;;  %s648_s26 = int_to_ptr.vmem [resolvable:$false] %s647_s26 }
  0x60   : > { %p645_p6 = pnand %p644_p13, %p855_p10  ;;  %s649_s7 = scalar_lea.vmem %s648_s26, 256 }
  0x61   : > { %p650_p12 = scmp.lt.s32.totalorder %s920_s22, %s648_s26  ;;  %p651_p11 = scmp.lt.s32.totalorder %s649_s7, %s643_s29 }
  0x62   : > { %506 = vmatpush3.bf16.msra.mxu0 %v505_v7  ;;  %p646_p8 = pneg %p645_p6 }
  0x63   : > { %p652_p0 = por %p651_p11, %p650_p12 }
  0x65   : > { %499 = vmatmul.mubr.msk.f32.vlgmr.msra.gmra.mrb[0].mxu0 %vm242_vm1, %v237_v8  ;;  %p653_p5 = pnand %p652_p0, %p646_p8 }
 0x138   : > { %v312_v9 = vpop.f32.mrb[0].mxu0 }
 0x139   : > { %316 = vst [vmem:[%s220_s20] sm:$0xff] %v312_v9  ;;  %v500_v10 = vpop.f32.mrb[1].mxu0  ;;  %v317_v11 = vmul.f32 %v312_v9, %v312_v9 }
 0x13b   : > { %318 = vadd.xlane.f32.xlu0 %v317_v11 }
 0x13c   : > { %656 = shalt.err (!%p653_p5)
}
 0x13d   : > { %s657_s8 = scalar_lea.hbm %s342_s11, 128  ;;  %s661_s25 = scalar_lea.hbm %s973_s2, 256 }
 0x13e   : > { %p658_p9 = scmp.ne.s32.totalorder %s342_s11, %s657_s8  ;;  %p662_p7 = scmp.lt.u32.totalorder %s342_s11, %s973_s2 }
 0x13f   : > { %p663_p3 = scmp.lt.u32.totalorder %s661_s25, %s657_s8  ;;  %p665_p13 = scmp.lt.u32.totalorder %s657_s8, %s342_s11 }
 0x140   : > { %p659_p1 = pnand %p658_p9, %p855_p10 }
 0x141   : > { %p664_p4 = por %p663_p3, %p662_p7 }
 0x142   : > { %p660_p2 = pneg %p659_p1 }
 0x143   : > { %p666_p6 = por %p665_p13, %p664_p4 }
 0x145   : > { %p667_p8 = pnand %p666_p6, %p660_p2 }
 0x147   : > { %670 = shalt.err (!%p667_p8)
}
 0x148   : > { %513 = dma.vmem_to_hbm [thread:$0]  (%p855_p10), %s920_s22, 128, %s342_s11, %s323_s18   ;;  %vm320_vm2 = vcmask 7168  }
 0x149   : > { %p230_p12 = scmp.lt.s32.totalorder %s721_s15, 1 }
 0x14b   : > { %s1002_s15 = smov (!%p230_p12, %s721_s15), 1 }
 0x14c   : > { %s479_s20 = sshll.u32 %s1002_s15, 3 }
 0x14d   : > { %s236_s10 = scalar_lea.vmem %s974_s3, %s479_s20 }
 0x1c8   : > { %v319_v12 = vpop.xlane.xlu0 %318 }
 0x1c9   : > { %321 = vst.msk [vmem:[%s236_s10] sm:$0xff] %vm320_vm2, %v319_v12 }
 0x1ca PF: > { %s359_s29 = sand.u32 1, %s709_s12   ;;  %p992_p11 = scmp.ne.s32.totalorder %s982_s23, 0 }
 0x1cb   : > { %p993_p0 = scmp.ge.s32.totalorder %s729_s17, 2  ;;  %s360_s30 = scalar_lea.sflag [#allocation4], %s359_s29 }
 0x1cd   : > { %p524_p5 = pnand %p993_p0, %p992_p11 }
 0x1cf   : > { %704 = dma.done.wait (!%p524_p5), %s360_s30, 128  }
 0x1d0   : > { %706 = vsyncadd (!%p524_p5), %s360_s30, 4294967168  ;;  %s21_s17 = sadd.s32 1, %s729_s17   ;;  %s994_s12 = smov %s713_s13 }
 0x1d1   : > { %p18_p10 = scmp.ge.s32.totalorder %s21_s17, 4   ;;  %s995_s13 = smov %s717_s14 }
 0x1d2   : > { %s996_s14 = smov %s864_s5  ;;  %s997_s15 = smov %s725_s16 }
 0x1d3   : > { %s998_s16 = smov %s1000_s28  ;;  %20 = sbr.rel (!%p18_p10) target bundleno = 7 (0x7), region = 89 }
 0x1da   :  { %375 = vsyncpa [#allocation3], 1 }
 0x1db   :  { %377 = vsyncpa [#allocation3 + $0x1], 1 }
 0x1dc   :  { %378 = vsyncpa [#allocation6], 1 }
 0x1dd   :  { %379 = vsyncpa [#allocation4], 1 }
 0x1de   :  { %381 = vsyncpa [#allocation4 + $0x1], 1 }

</bundles_post_ra>
